<compile_context>
chip_gen: v5e
topology: v5e:2x2
jax: 0.10.0
libtpu: 0.0.40
codegen_flags: <defaults>
</compile_context>

<pallas_src>
import math
import numpy as np
import jax
import jax.numpy as jnp
from jax.experimental import pallas as pl
from jax.experimental.pallas import tpu as pltpu

# db4 decomposition filters (pywt convention).
_DB4_DEC_LO = np.array(
    [-0.010597401784997278, 0.032883011666982945, 0.030841381835986965,
     -0.18703481171888114, -0.02798376941698385, 0.6308807679295904,
     0.7148465705525415, 0.23037781330885523], dtype=np.float64)
_DB4_DEC_HI = np.array(
    [-0.23037781330885523, 0.7148465705525415, -0.6308807679295904,
     -0.02798376941698385, 0.18703481171888114, 0.030841381835986965,
     -0.032883011666982945, -0.010597401784997278], dtype=np.float64)


def _dwt_matrix(L: int) -> np.ndarray:
    """(L, L) matrix: first L//2 rows = low-pass stride-2 DWT (zero-padded),
    last L//2 rows = high-pass DWT, along an axis of length L."""
    filt_lo = _DB4_DEC_LO[::-1]   # conv (cross-correlation) filter = reversed dec filter
    filt_hi = _DB4_DEC_HI[::-1]
    K = len(filt_lo)
    p = K // 2 - 1                # pad = 3 -> output length L//2 for even L
    Lo = L // 2
    M = np.zeros((L, L), dtype=np.float64)
    for j in range(Lo):
        for k in range(K):
            i = 2 * j + k - p
            if 0 <= i < L:
                M[j, i] += filt_lo[k]
                M[Lo + j, i] += filt_hi[k]
    return M


# ------------------------------ fused Pallas kernel -------------------------------

def _fused_wavelet_pool_kernel(x_ref, mhwT_ref, g_ref, bias_ref, o_ref):
    """Per batch element n:
      x_ref   : (1, C*T, H*W)     input slab (rows = (c,t), cols = (h,w))
      mhwT_ref: (H*W, H*W)        transposed row-permuted kron(Dh, Dw)
      g_ref   : (4, O*T2, C*T)    T-DWT + conv + subband permutation, per HW-subband
      bias_ref: (O*T2, 1)         conv bias repeated over t2
      o_ref   : (1, O*T2, H2*W2)  output slab (rows = (o,t2), cols = (h2,w2))
    """
    x = x_ref[0]                                                     # (C*T, H*W)
    # Stage 1: fused H+W DWT, lane-dense (H*W columns), full MXU feed.
    y1 = jnp.dot(x, mhwT_ref[...], preferred_element_type=jnp.float32)
    # y1 columns are (s_hw, h2, w2) with s_hw = sh*2 + sw.

    n_sub = g_ref.shape[0]            # 4
    ot2 = o_ref.shape[1]
    hw2 = o_ref.shape[2]
    acc = jnp.zeros((ot2, hw2), jnp.float32)
    # Stage 2: T-DWT + subband permutation + 1x1x1 conv, folded into G at trace time.
    for s in range(n_sub):            # static, unrolled (4 small MXU dots)
        acc = acc + jnp.dot(g_ref[s], y1[:, s * hw2:(s + 1) * hw2],
                            preferred_element_type=jnp.float32)
    o_ref[0] = (acc + bias_ref[...]).astype(o_ref.dtype)


def wavelet_pooling(x, conv_w, conv_b):
    """WaveletPooling forward.  x: (N, C, T, H, W); conv_w: (O, 8*C); conv_b: (O,)."""
    N, C, T, H, W = x.shape
    O = conv_w.shape[0]
    assert T % 2 == 0 and H % 2 == 0 and W % 2 == 0, "even T, H, W required"
    T2, H2, W2 = T // 2, H // 2, W // 2
    CT, HW, OT2, HW2 = C * T, H * W, O * T2, H2 * W2

    # ---- trace-time constant matrices (numpy, float64 -> float32) ----
    Dt, Dh, Dw = _dwt_matrix(T), _dwt_matrix(H), _dwt_matrix(W)
    # Row-permuted kron: row index = (sh*2+sw)*H2*W2 + h2*W2 + w2.
    K0 = np.kron(Dh, Dw)                                   # rows: (sh, h2, sw, w2)
    Mhw = K0.reshape(2, H2, 2, W2, HW).transpose(0, 2, 1, 3, 4).reshape(HW, HW)
    MhwT = jnp.asarray(Mhw.T.astype(np.float32))           # pass pre-transposed

    # G[s_hw, o*T2+t2, c*T+t] = sum_st conv_w[o, st*4C+sh*2C+sw*C+c] * Dt[st*T2+t2, t]
    cw = conv_w.astype(jnp.float32).reshape(O, 2, 2, 2, C)            # (o, st, sh, sw, c)
    Dt_r = jnp.asarray(Dt.astype(np.float32)).reshape(2, T2, T)       # (st, t2, t)
    G = jnp.einsum('oabgc,aut->bgouct', cw, Dt_r).reshape(4, OT2, CT)
    bias = jnp.repeat(conv_b.astype(jnp.float32), T2).reshape(OT2, 1)

    x2 = x.astype(jnp.float32).reshape(N, CT, HW)          # free, contiguous reshape

    out = pl.pallas_call(
        _fused_wavelet_pool_kernel,
        out_shape=jax.ShapeDtypeStruct((N, OT2, HW2), jnp.float32),
        grid_spec=pltpu.PrefetchScalarGridSpec(
            num_scalar_prefetch=0,
            grid=(N,),
            in_specs=[
                pl.BlockSpec((1, CT, HW), lambda n: (n, 0, 0)),
                pl.BlockSpec((HW, HW), lambda n: (0, 0)),       # resident across grid
                pl.BlockSpec((4, OT2, CT), lambda n: (0, 0, 0)),
                pl.BlockSpec((OT2, 1), lambda n: (0, 0)),
            ],
            out_specs=pl.BlockSpec((1, OT2, HW2), lambda n: (n, 0, 0)),
        ),
        compiler_params=pltpu.CompilerParams(
            dimension_semantics=("parallel",),                  # shards N over TCs (v7x)
        ),
    )(x2, MhwT, G, bias)

    return out.reshape(N, O, T2, H2, W2)                    # free, contiguous reshape


# ------------------------------ pure-JAX reference --------------------------------

def wavelet_pooling_reference(x, conv_w, conv_b):
    N, C, T, H, W = x.shape
    O = conv_w.shape[0]
    T2, H2, W2 = T // 2, H // 2, W // 2
    hi = jax.lax.Precision.HIGHEST
    Dt = jnp.asarray(_dwt_matrix(T).astype(np.float32))
    Dh = jnp.asarray(_dwt_matrix(H).astype(np.float32))
    Dw = jnp.asarray(_dwt_matrix(W).astype(np.float32))
    y = jnp.einsum('ncthw,vw->ncthv', x, Dw, precision=hi)   # W-axis DWT
    y = jnp.einsum('ncthv,uh->nctuv', y, Dh, precision=hi)   # H-axis DWT
    y = jnp.einsum('nctuv,st->ncsuv', y, Dt, precision=hi)   # T-axis DWT
    y = y.reshape(N, C, 2, T2, 2, H2, 2, W2)                 # (n,c,st,t2,sh,h2,sw,w2)
    y = jnp.transpose(y, (0, 2, 4, 6, 1, 3, 5, 7)).reshape(N, 8 * C, T2, H2, W2)
    out = jnp.einsum('nkthw,ok->nothw', y, conv_w, precision=hi)
    return out + conv_b[None, :, None, None, None]


# ----------------------------------- main ------------------------------------------

if __name__ == "__main__":
    key = jax.random.PRNGKey(0)
    k1, k2, k3 = jax.random.split(key, 3)

    N, C, T, H, W = 2, 4, 8, 16, 16     # in_channels = 4
    O = 8                               # out_channels = 8

    x = jax.random.normal(k1, (N, C, T, H, W), dtype=jnp.float32)

    # Conv3d(in_channels * 8, out_channels, (1,1,1)) parameters, deterministic init.
    fan_in = 8 * C
    conv_w = jax.random.normal(k2, (O, 8 * C), dtype=jnp.float32) / math.sqrt(fan_in)
    conv_b = 0.1 * jax.random.normal(k3, (O,), dtype=jnp.float32)

    out = wavelet_pooling(x, conv_w, conv_b)
    out = jax.block_until_ready(out)

    ref = wavelet_pooling_reference(x, conv_w, conv_b)
    ref = jax.block_until_ready(ref)

    assert out.shape == (N, O, T // 2, H // 2, W // 2), out.shape
    assert bool(jnp.all(jnp.isfinite(out)))
    assert bool(jnp.allclose(out, ref, rtol=1e-2, atol=1e-2)), "Pallas vs JAX mismatch"

    print("KERNEL_OK")
</pallas_src>

<mosaic_0001>
module attributes {stable_mosaic.version = 11 : i64} {
  func.func @_fused_wavelet_pool_kernel(%arg0: i32, %arg1: memref<1x32x256xf32, #tpu.memory_space<vmem>>, %arg2: memref<256x256xf32, #tpu.memory_space<vmem>>, %arg3: memref<4x32x32xf32, #tpu.memory_space<vmem>>, %arg4: memref<32x1xf32, #tpu.memory_space<vmem>>, %arg5: memref<1x32x64xf32, #tpu.memory_space<vmem>>) attributes {dimension_semantics = [#tpu.dimension_semantics<parallel>], iteration_bounds = array<i64: 2>, scalar_prefetch = 0 : i64, scratch_operands = 0 : i64, tpu.core_type = #tpu.core_type<tc>, window_params = [{transform_indices = @transform_0, window_bounds = array<i64: 1, 32, 256>}, {pipeline_mode = #tpu.pipeline_mode<synchronous>, transform_indices = @transform_1, window_bounds = array<i64: 256, 256>}, {pipeline_mode = #tpu.pipeline_mode<synchronous>, transform_indices = @transform_2, window_bounds = array<i64: 4, 32, 32>}, {pipeline_mode = #tpu.pipeline_mode<synchronous>, transform_indices = @transform_3, window_bounds = array<i64: 32, 1>}, {transform_indices = @transform_4, window_bounds = array<i64: 1, 32, 64>}]} {
    %c0 = arith.constant 0 : index
    %c0_0 = arith.constant 0 : index
    %c0_1 = arith.constant 0 : index
    %0 = vector.load %arg1[%c0, %c0_0, %c0_1] : memref<1x32x256xf32, #tpu.memory_space<vmem>>, vector<1x32x256xf32>
    %1 = vector.shape_cast %0 : vector<1x32x256xf32> to vector<32x256xf32>
    %c0_2 = arith.constant 0 : index
    %c0_3 = arith.constant 0 : index
    %2 = vector.load %arg2[%c0_2, %c0_3] : memref<256x256xf32, #tpu.memory_space<vmem>>, vector<256x256xf32>
    %cst = arith.constant dense<0.000000e+00> : vector<32x256xf32>
    %3 = tpu.matmul %1, %2, %cst {dimension_numbers = #tpu.dot_dimension_numbers<[1], [0], [0], [1], [0, 0, 1, 1], [], []>} : vector<32x256xf32>, vector<256x256xf32>, vector<32x256xf32> -> vector<32x256xf32>
    %cst_4 = arith.constant 0.000000e+00 : f32
    %4 = vector.broadcast %cst_4 : f32 to vector<32x64xf32>
    %c0_5 = arith.constant 0 : index
    %c0_6 = arith.constant 0 : index
    %c0_7 = arith.constant 0 : index
    %5 = vector.load %arg3[%c0_5, %c0_6, %c0_7] : memref<4x32x32xf32, #tpu.memory_space<vmem>>, vector<1x32x32xf32>
    %6 = vector.shape_cast %5 : vector<1x32x32xf32> to vector<32x32xf32>
    %7 = vector.extract_strided_slice %3 {offsets = [0, 0], sizes = [32, 64], strides = [1, 1]} : vector<32x256xf32> to vector<32x64xf32>
    %cst_8 = arith.constant dense<0.000000e+00> : vector<32x64xf32>
    %8 = tpu.matmul %6, %7, %cst_8 {dimension_numbers = #tpu.dot_dimension_numbers<[1], [0], [0], [1], [0, 0, 1, 1], [], []>} : vector<32x32xf32>, vector<32x64xf32>, vector<32x64xf32> -> vector<32x64xf32>
    %9 = arith.addf %4, %8 : vector<32x64xf32>
    %c1 = arith.constant 1 : index
    %c0_9 = arith.constant 0 : index
    %c0_10 = arith.constant 0 : index
    %10 = vector.load %arg3[%c1, %c0_9, %c0_10] : memref<4x32x32xf32, #tpu.memory_space<vmem>>, vector<1x32x32xf32>
    %11 = vector.shape_cast %10 : vector<1x32x32xf32> to vector<32x32xf32>
    %12 = vector.extract_strided_slice %3 {offsets = [0, 64], sizes = [32, 64], strides = [1, 1]} : vector<32x256xf32> to vector<32x64xf32>
    %cst_11 = arith.constant dense<0.000000e+00> : vector<32x64xf32>
    %13 = tpu.matmul %11, %12, %cst_11 {dimension_numbers = #tpu.dot_dimension_numbers<[1], [0], [0], [1], [0, 0, 1, 1], [], []>} : vector<32x32xf32>, vector<32x64xf32>, vector<32x64xf32> -> vector<32x64xf32>
    %14 = arith.addf %9, %13 : vector<32x64xf32>
    %c2 = arith.constant 2 : index
    %c0_12 = arith.constant 0 : index
    %c0_13 = arith.constant 0 : index
    %15 = vector.load %arg3[%c2, %c0_12, %c0_13] : memref<4x32x32xf32, #tpu.memory_space<vmem>>, vector<1x32x32xf32>
    %16 = vector.shape_cast %15 : vector<1x32x32xf32> to vector<32x32xf32>
    %17 = vector.extract_strided_slice %3 {offsets = [0, 128], sizes = [32, 64], strides = [1, 1]} : vector<32x256xf32> to vector<32x64xf32>
    %cst_14 = arith.constant dense<0.000000e+00> : vector<32x64xf32>
    %18 = tpu.matmul %16, %17, %cst_14 {dimension_numbers = #tpu.dot_dimension_numbers<[1], [0], [0], [1], [0, 0, 1, 1], [], []>} : vector<32x32xf32>, vector<32x64xf32>, vector<32x64xf32> -> vector<32x64xf32>
    %19 = arith.addf %14, %18 : vector<32x64xf32>
    %c3 = arith.constant 3 : index
    %c0_15 = arith.constant 0 : index
    %c0_16 = arith.constant 0 : index
    %20 = vector.load %arg3[%c3, %c0_15, %c0_16] : memref<4x32x32xf32, #tpu.memory_space<vmem>>, vector<1x32x32xf32>
    %21 = vector.shape_cast %20 : vector<1x32x32xf32> to vector<32x32xf32>
    %22 = vector.extract_strided_slice %3 {offsets = [0, 192], sizes = [32, 64], strides = [1, 1]} : vector<32x256xf32> to vector<32x64xf32>
    %cst_17 = arith.constant dense<0.000000e+00> : vector<32x64xf32>
    %23 = tpu.matmul %21, %22, %cst_17 {dimension_numbers = #tpu.dot_dimension_numbers<[1], [0], [0], [1], [0, 0, 1, 1], [], []>} : vector<32x32xf32>, vector<32x64xf32>, vector<32x64xf32> -> vector<32x64xf32>
    %24 = arith.addf %19, %23 : vector<32x64xf32>
    %c0_18 = arith.constant 0 : index
    %c0_19 = arith.constant 0 : index
    %25 = vector.load %arg4[%c0_18, %c0_19] : memref<32x1xf32, #tpu.memory_space<vmem>>, vector<32x1xf32>
    %26 = vector.broadcast %25 : vector<32x1xf32> to vector<32x64xf32>
    %27 = arith.addf %24, %26 : vector<32x64xf32>
    %c0_20 = arith.constant 0 : index
    %c0_21 = arith.constant 0 : index
    %c0_22 = arith.constant 0 : index
    %28 = vector.load %arg5[%c0_20, %c0_21, %c0_22] : memref<1x32x64xf32, #tpu.memory_space<vmem>>, vector<1x32x64xf32>
    %29 = vector.shape_cast %28 : vector<1x32x64xf32> to vector<32x64xf32>
    %30 = vector.shape_cast %27 : vector<32x64xf32> to vector<1x32x64xf32>
    tpu.vector_store %arg5[%c0_20, %c0_21, %c0_22], %30 {strides = array<i32>} : memref<1x32x64xf32, #tpu.memory_space<vmem>>, vector<1x32x64xf32>,
    return
  }
  func.func @transform_0(%arg0: i32) -> (i32, i32, i32) {
    %c0_i32 = arith.constant 0 : i32
    %c0_i32_0 = arith.constant 0 : i32
    %c0_i32_1 = arith.constant 0 : i32
    return %arg0, %c0_i32, %c0_i32_0 : i32, i32, i32
  }
  func.func @transform_1(%arg0: i32) -> (i32, i32) {
    %c0_i32 = arith.constant 0 : i32
    %c0_i32_0 = arith.constant 0 : i32
    %c0_i32_1 = arith.constant 0 : i32
    return %c0_i32, %c0_i32_0 : i32, i32
  }
  func.func @transform_2(%arg0: i32) -> (i32, i32, i32) {
    %c0_i32 = arith.constant 0 : i32
    %c0_i32_0 = arith.constant 0 : i32
    %c0_i32_1 = arith.constant 0 : i32
    %c0_i32_2 = arith.constant 0 : i32
    return %c0_i32, %c0_i32_0, %c0_i32_1 : i32, i32, i32
  }
  func.func @transform_3(%arg0: i32) -> (i32, i32) {
    %c0_i32 = arith.constant 0 : i32
    %c0_i32_0 = arith.constant 0 : i32
    %c0_i32_1 = arith.constant 0 : i32
    return %c0_i32, %c0_i32_0 : i32, i32
  }
  func.func @transform_4(%arg0: i32) -> (i32, i32, i32) {
    %c0_i32 = arith.constant 0 : i32
    %c0_i32_0 = arith.constant 0 : i32
    %c0_i32_1 = arith.constant 0 : i32
    return %arg0, %c0_i32, %c0_i32_0 : i32, i32, i32
  }
}

</mosaic_0001>

<bundles_post_ra>
// kernel: tpu_custom_call.1
= control target key start
LH: loop header
LB: loop body
LE: loop exit
PB: predicated region body
PF: predicated region fallthrough
CT: control target
= control target key end

     0   :  { %9 = vsyncpa [#allocation3], 0  ;;  %s1332_s0 = inlined_call_operand.hbm [shape: f32[2,32,256], index: 0, kind: input, shape index: {}]   ;;  %s1333_s1 = inlined_call_operand.hbm [shape: f32[256,256], index: 1, kind: input, shape index: {}]   ;;  %s1334_s2 = inlined_call_operand.hbm [shape: f32[4,32,32], index: 2, kind: input, shape index: {}]   ;;  %s1335_s3 = inlined_call_operand.vmem [shape: f32[32,1], index: 3, kind: input, shape index: {}]   ;;  %s1336_s4 = inlined_call_operand.hbm [shape: f32[2,32,64], index: 4, kind: output, shape index: {}]  }
   0x1   :  { %11 = vsyncpa [#allocation3 + $0x1], 0 }
   0x2   :  { %12 = vsyncpa [#allocation6], 0 }
   0x3   :  { %13 = vsyncpa [#allocation4], 0 }
   0x4   :  { %15 = vsyncpa [#allocation4 + $0x1], 0  ;;  %s1135_s15 = smov 0   ;;  %s1137_s16 = smov 0  }
   0x5   :  { %s1139_s17 = smov 0   ;;  %s1141_s18 = smov 0  }
   0x6 LB: > { %s1156_s19 = sadd.s32 4294967295, %s1098_s18   ;;  %s804_s20 = sadd.s32 4294967294, %s1098_s18   ;;  %s1098_s18 = sphi %s1141_s18, %s1346_s18   ;;  %s1094_s17 = sphi %s1139_s17, %s1345_s17   ;;  %s1090_s16 = sphi %s1137_s16, %s1344_s16   ;;  %s1086_s15 = sphi %s1135_s15, %s1343_s15  }
   0x7   : > { %p41_p0 = scmp.ne.s32.totalorder %s1090_s16, %s1086_s15  ;;  %p42_p1 = scmp.eq.s32.totalorder %s1156_s19, 0 }
   0x8   : > { %p128_p2 = scmp.eq.s32.totalorder %s1156_s19, 1  ;;  %p134_p3 = scmp.eq.s32.totalorder %s804_s20, 1 }
   0x9   : > { %p1165_p4 = por %p42_p1, %p41_p0  ;;  %p805_p5 = scmp.ge.s32.totalorder %s1098_s18, 1 }
   0xa   : > { %p1170_p6 = por %p134_p3, %p41_p0  ;;  %p141_p7 = scmp.lt.s32.totalorder %s1098_s18, 3 }
   0xb   : > { %s152_s25 = sshll.u32 %s1333_s1, 4  ;;  %s1100_s27 = smov [#allocation5]   ;;  %s153_s25 = int_to_ptr.hbm [resolvable:$true] %s152_s25 }
   0xc   : > { %p1178_p8 = pnand %p805_p5, %p141_p7  ;;  %s154_s28 = sshll.u32 %s1100_s27, 4  ;;  %s155_s28 = int_to_ptr.vmem [resolvable:$true] %s154_s28 }
   0xd   : > { %s166_s5 = sshll.u32 %s1334_s2, 4  ;;  %s1101_s6 = smov 256   ;;  %s167_s5 = int_to_ptr.hbm [resolvable:$true] %s166_s5 }
   0xe   : > { %p852_p9 = pneg %p1178_p8  ;;  %s1102_s7 = smov 16  }
   0xf   : > { %s1103_s8 = smov [#allocation7]   ;;  %s1104_s10 = smov 128  }
  0x10   : > { %p853_p10 = pnand %p852_p9, %p42_p1  ;;  %s168_s9 = sshll.u32 %s1103_s8, 4  ;;  %s169_s9 = int_to_ptr.vmem [resolvable:$true] %s168_s9 }
  0x11   : > { %s1105_s11 = smov 8   ;;  %s1194_s12 = sadd.s32 1, %s1098_s18  }
  0x12   : > { %855 = dma.hbm_to_vmem [thread:$0]  (!%p853_p10), %s153_s25, 8192, %s155_s28, [#allocation6], %s1101_s6, %s1101_s6, %s1102_s7  }
  0x13   : > { %858 = dma.hbm_to_vmem [thread:$0]  (!%p853_p10), %s167_s5, 2048, %s169_s9, [#allocation6], %s1104_s10, %s1104_s10, %s1105_s11  }
  0x14   : > { %s25_s13 = ssub.s32 %s1098_s18, %s1194_s12  ;;  %s28_s14 = sadd.s32 1, %s1094_s17 }
  0x15   : > { %p26_p12 = scmp.eq.s32.totalorder %s25_s13, 0  ;;  %p35_p13 = scmp.ne.s32.totalorder %s1094_s17, %s1090_s16 }
  0x16   : > { %p36_p0 = scmp.eq.s32.totalorder %s1098_s18, 0  ;;  %p869_p7 = scmp.lt.s32.totalorder %s1098_s18, 2 }
  0x17   : > { %s1203_s20 = scalar_select %p26_p12, %s1094_s17, %s28_s14  }
  0x18   : > { %p37_p3 = por %p36_p0, %p35_p13  ;;  %p1207_p5 = por %p128_p2, %p35_p13 }
  0x19   : > { %s185_s24 = sand.u32 1, %s1094_s17   ;;  %s838_s27 = sshll.u32 %s1098_s18, 6 }
  0x1a   : > { %s809_s25 = sshll.u32 %s185_s24, 6  ;;  %s194_s30 = scalar_lea.hbm %s1332_s0, %s838_s27 }
  0x1b   : > { %s189_s5 = scalar_lea.vmem [#allocation2], %s809_s25  ;;  %s195_s9 = sshll.u32 %s194_s30, 4  ;;  %s196_s9 = int_to_ptr.hbm [resolvable:$true] %s195_s9 }
  0x1c   : > { %s197_s8 = sshll.u32 %s189_s5, 4  ;;  %p1217_p9 = pnand %p869_p7, %p37_p3  ;;  %s198_s8 = int_to_ptr.vmem [resolvable:$true] %s197_s8 }
  0x1d   : > { %s186_s11 = scalar_lea.sflag [#allocation3], %s185_s24  ;;  %s998_s13 = sshra.s32 %s196_s9, 4  ;;  %s999_s13 = int_to_ptr.hbm [resolvable:$true] %s998_s13 }
  0x1e   : > { %s1000_s14 = scalar_lea.hbm %s999_s13, 64  ;;  %p1002_p10 = pneg %p1217_p9 }
  0x1f   : > { %p1001_p2 = scmp.ne.s32.totalorder %s999_s13, %s1000_s14  ;;  %s1005_s28 = scalar_lea.hbm %s1332_s0, 128 }
  0x20   : > { %p1006_p0 = scmp.lt.s32.totalorder %s999_s13, %s1332_s0  ;;  %p1007_p3 = scmp.lt.s32.totalorder %s1005_s28, %s1000_s14 }
  0x21   : > { %p1003_p12 = pnand %p1002_p10, %p1001_p2 }
  0x22   : > { %p1008_p7 = por %p1007_p3, %p1006_p0 }
  0x23   : > { %p1004_p13 = pneg %p1003_p12 }
  0x25   : > { %p1009_p11 = pnand %p1008_p7, %p1004_p13 }
  0x27   : > { %1012 = shalt.err (!%p1009_p11)
}
  0x28   : > { %862 = dma.hbm_to_vmem [thread:$0]  (!%p1217_p9), %s196_s9, 1024, %s198_s8, %s186_s11, %s1101_s6, %s1101_s6, %s1102_s7  }
  0x29   : > { %209 = sbr.rel (%p1178_p8) target bundleno = 537 (0x219), region = 36  ;;  %s1237_s24 = sand.u32 (!%p1178_p8), 1, %s1090_s16  }
  0x2a   : > { %s813_s5 = sshll.u32 (!%p1178_p8), %s1237_s24, 6  ;;  %s212_s13 = scalar_lea.sflag (!%p1178_p8), [#allocation3], %s1237_s24 }
  0x2b   : > { %s1241_s14 = scalar_lea.vmem (!%p1178_p8), [#allocation2], %s813_s5 }
  0x2e   : > { %1073 = dma.done.wait (%p1165_p4), %s212_s13, 1024  }
  0x2f   : > { %1075 = vsyncadd (%p1165_p4), %s212_s13, 4294966272 }
  0x30   : > { %1077 = dma.done.wait (%p42_p1), [#allocation6], 10240  }
  0x31   : > { %1079 = vsyncadd (%p42_p1), [#allocation6], 4294957056  ;;  %v289_v0 = vld [vmem:[#allocation5 + $0xf0] sm:$0xff]  ;;  %v290_v2 = vld [vmem:[#allocation5 + $0xf8] sm:$0xff]  ;;  %s1106_s21 = smov 64   ;;  %vm464_vm0 = vcmask 261120  }
  0x32   : > { %v321_v1 = vld [vmem:[#allocation5 + $0x1f0] sm:$0xff]  ;;  %323 = vmatpush.msra.mxu0 %v289_v0  ;;  %v322_v3 = vld [vmem:[#allocation5 + $0x1f8] sm:$0xff]  ;;  %v287_v4 = vld [vmem:[#allocation5 + $0xe0] sm:$0xff]  ;;  %381 = vmatpush.msra.mxu2 %v290_v2  ;;  %s816_s25 = sshll.u32 %s1237_s24, 5  ;;  %vm691_vm1 = vcmask 523264   ;;  %s839_s29 = sshll.u32 %s1156_s19, 5 }
  0x33   : > { %352 = vmatpush.msra.mxu1 %v321_v1  ;;  %v319_v5 = vld [vmem:[#allocation5 + $0x1e0] sm:$0xff]  ;;  %410 = vmatpush.msra.mxu3 %v322_v3  ;;  %v288_v6 = vld [vmem:[#allocation5 + $0xe8] sm:$0xff]  ;;  %v285_v8 = vld [vmem:[#allocation5 + $0xd0] sm:$0xff]  ;;  %s1288_s28 = scalar_lea.vmem [#allocation8], %s816_s25  ;;  %s708_s13 = scalar_lea.hbm %s1336_s4, %s839_s29 }
  0x34   : > { %v320_v7 = vld [vmem:[#allocation5 + $0x1e8] sm:$0xff]  ;;  %324 = vmatpush.msra.mxu0 %v287_v4  ;;  %v317_v9 = vld [vmem:[#allocation5 + $0x1d0] sm:$0xff]  ;;  %v286_v10 = vld [vmem:[#allocation5 + $0xd8] sm:$0xff]  ;;  %382 = vmatpush.msra.mxu2 %v288_v6  ;;  %s697_s19 = scalar_lea.sflag [#allocation4], %s1237_s24  ;;  %s1048_s9 = scalar_lea.hbm %s1336_s4, 64 }
  0x35   : > { %353 = vmatpush.msra.mxu1 %v319_v5  ;;  %v318_v11 = vld [vmem:[#allocation5 + $0x1d8] sm:$0xff]  ;;  %411 = vmatpush.msra.mxu3 %v320_v7  ;;  %v283_v12 = vld [vmem:[#allocation5 + $0xc0] sm:$0xff]  ;;  %v284_v14 = vld [vmem:[#allocation5 + $0xc8] sm:$0xff] }
  0x36   : > { %v315_v13 = vld [vmem:[#allocation5 + $0x1c0] sm:$0xff]  ;;  %325 = vmatpush.msra.mxu0 %v285_v8  ;;  %v316_v15 = vld [vmem:[#allocation5 + $0x1c8] sm:$0xff]  ;;  %383 = vmatpush.msra.mxu2 %v286_v10  ;;  %v281_v16 = vld [vmem:[#allocation5 + $0xb0] sm:$0xff] }
  0x37   : > { %354 = vmatpush.msra.mxu1 %v317_v9  ;;  %412 = vmatpush.msra.mxu3 %v318_v11  ;;  %v313_v17 = vld [vmem:[#allocation5 + $0x1b0] sm:$0xff]  ;;  %v282_v18 = vld [vmem:[#allocation5 + $0xb8] sm:$0xff]  ;;  %v279_v20 = vld [vmem:[#allocation5 + $0xa0] sm:$0xff] }
  0x38   : > { %326 = vmatpush.msra.mxu0 %v283_v12  ;;  %v314_v19 = vld [vmem:[#allocation5 + $0x1b8] sm:$0xff]  ;;  %384 = vmatpush.msra.mxu2 %v284_v14  ;;  %v311_v21 = vld [vmem:[#allocation5 + $0x1a0] sm:$0xff]  ;;  %v280_v22 = vld [vmem:[#allocation5 + $0xa8] sm:$0xff] }
  0x39   : > { %355 = vmatpush.msra.mxu1 %v315_v13  ;;  %413 = vmatpush.msra.mxu3 %v316_v15  ;;  %v312_v23 = vld [vmem:[#allocation5 + $0x1a8] sm:$0xff]  ;;  %v277_v24 = vld [vmem:[#allocation5 + $0x90] sm:$0xff]  ;;  %v278_v26 = vld [vmem:[#allocation5 + $0x98] sm:$0xff] }
  0x3a   : > { %327 = vmatpush.msra.mxu0 %v281_v16  ;;  %385 = vmatpush.msra.mxu2 %v282_v18  ;;  %v309_v25 = vld [vmem:[#allocation5 + $0x190] sm:$0xff]  ;;  %v310_v27 = vld [vmem:[#allocation5 + $0x198] sm:$0xff]  ;;  %v275_v28 = vld [vmem:[#allocation5 + $0x80] sm:$0xff] }
  0x3b   : > { %356 = vmatpush.msra.mxu1 %v313_v17  ;;  %414 = vmatpush.msra.mxu3 %v314_v19  ;;  %v307_v29 = vld [vmem:[#allocation5 + $0x180] sm:$0xff]  ;;  %v276_v30 = vld [vmem:[#allocation5 + $0x88] sm:$0xff]  ;;  %v273_v32 = vld [vmem:[#allocation5 + $0x70] sm:$0xff] }
  0x3c   : > { %328 = vmatpush.msra.mxu0 %v279_v20  ;;  %386 = vmatpush.msra.mxu2 %v280_v22  ;;  %v308_v31 = vld [vmem:[#allocation5 + $0x188] sm:$0xff]  ;;  %v305_v33 = vld [vmem:[#allocation5 + $0x170] sm:$0xff]  ;;  %v274_v34 = vld [vmem:[#allocation5 + $0x78] sm:$0xff] }
  0x3d   : > { %357 = vmatpush.msra.mxu1 %v311_v21  ;;  %415 = vmatpush.msra.mxu3 %v312_v23  ;;  %v306_v35 = vld [vmem:[#allocation5 + $0x178] sm:$0xff]  ;;  %v271_v36 = vld [vmem:[#allocation5 + $0x60] sm:$0xff]  ;;  %v272_v38 = vld [vmem:[#allocation5 + $0x68] sm:$0xff] }
  0x3e   : > { %329 = vmatpush.msra.mxu0 %v277_v24  ;;  %387 = vmatpush.msra.mxu2 %v278_v26  ;;  %v303_v37 = vld [vmem:[#allocation5 + $0x160] sm:$0xff]  ;;  %v304_v39 = vld [vmem:[#allocation5 + $0x168] sm:$0xff]  ;;  %v269_v40 = vld [vmem:[#allocation5 + $0x50] sm:$0xff] }
  0x3f   : > { %358 = vmatpush.msra.mxu1 %v309_v25  ;;  %416 = vmatpush.msra.mxu3 %v310_v27  ;;  %v301_v41 = vld [vmem:[#allocation5 + $0x150] sm:$0xff]  ;;  %v270_v42 = vld [vmem:[#allocation5 + $0x58] sm:$0xff]  ;;  %v267_v44 = vld [vmem:[#allocation5 + $0x40] sm:$0xff] }
  0x40   : > { %330 = vmatpush.msra.mxu0 %v275_v28  ;;  %388 = vmatpush.msra.mxu2 %v276_v30  ;;  %v302_v43 = vld [vmem:[#allocation5 + $0x158] sm:$0xff]  ;;  %v299_v45 = vld [vmem:[#allocation5 + $0x140] sm:$0xff]  ;;  %v268_v46 = vld [vmem:[#allocation5 + $0x48] sm:$0xff] }
  0x41   : > { %359 = vmatpush.msra.mxu1 %v307_v29  ;;  %417 = vmatpush.msra.mxu3 %v308_v31  ;;  %v300_v47 = vld [vmem:[#allocation5 + $0x148] sm:$0xff]  ;;  %v265_v48 = vld [vmem:[#allocation5 + $0x30] sm:$0xff]  ;;  %v266_v50 = vld [vmem:[#allocation5 + $0x38] sm:$0xff] }
  0x42   : > { %331 = vmatpush.msra.mxu0 %v273_v32  ;;  %389 = vmatpush.msra.mxu2 %v274_v34  ;;  %v297_v49 = vld [vmem:[#allocation5 + $0x130] sm:$0xff]  ;;  %v298_v51 = vld [vmem:[#allocation5 + $0x138] sm:$0xff]  ;;  %v263_v52 = vld [vmem:[#allocation5 + $0x20] sm:$0xff] }
  0x43   : > { %360 = vmatpush.msra.mxu1 %v305_v33  ;;  %418 = vmatpush.msra.mxu3 %v306_v35  ;;  %v295_v53 = vld [vmem:[#allocation5 + $0x120] sm:$0xff]  ;;  %v264_v54 = vld [vmem:[#allocation5 + $0x28] sm:$0xff]  ;;  %v261_v56 = vld [vmem:[#allocation5 + $0x10] sm:$0xff] }
  0x44   : > { %332 = vmatpush.msra.mxu0 %v271_v36  ;;  %390 = vmatpush.msra.mxu2 %v272_v38  ;;  %v296_v55 = vld [vmem:[#allocation5 + $0x128] sm:$0xff]  ;;  %v293_v57 = vld [vmem:[#allocation5 + $0x110] sm:$0xff]  ;;  %v262_v58 = vld [vmem:[#allocation5 + $0x18] sm:$0xff] }
  0x45   : > { %361 = vmatpush.msra.mxu1 %v303_v37  ;;  %419 = vmatpush.msra.mxu3 %v304_v39  ;;  %v294_v59 = vld [vmem:[#allocation5 + $0x118] sm:$0xff]  ;;  %v259_v60 = vld [vmem:[#allocation5] sm:$0xff]  ;;  %v260_v62 = vld [vmem:[#allocation5 + $0x8] sm:$0xff] }
  0x46   : > { %333 = vmatpush.msra.mxu0 %v269_v40  ;;  %391 = vmatpush.msra.mxu2 %v270_v42  ;;  %v291_v61 = vld [vmem:[#allocation5 + $0x100] sm:$0xff]  ;;  %v292_v63 = vld [vmem:[#allocation5 + $0x108] sm:$0xff]  ;;  %v253_v2 = vld [vmem:[%s1241_s14 + $0x10] sm:$0xff] }
  0x47   : > { %362 = vmatpush.msra.mxu1 %v301_v41  ;;  %420 = vmatpush.msra.mxu3 %v302_v43  ;;  %v251_v0 = vld [vmem:[%s1241_s14] sm:$0xff]  ;;  %v252_v1 = vld [vmem:[%s1241_s14 + $0x8] sm:$0xff]  ;;  %v254_v3 = vld [vmem:[%s1241_s14 + $0x18] sm:$0xff] }
  0x48   : > { %334 = vmatpush.msra.mxu0 %v267_v44  ;;  %392 = vmatpush.msra.mxu2 %v268_v46  ;;  %v255_v4 = vld [vmem:[%s1241_s14 + $0x20] sm:$0xff]  ;;  %v256_v5 = vld [vmem:[%s1241_s14 + $0x28] sm:$0xff]  ;;  %v257_v6 = vld [vmem:[%s1241_s14 + $0x30] sm:$0xff] }
  0x49   : > { %363 = vmatpush.msra.mxu1 %v299_v45  ;;  %421 = vmatpush.msra.mxu3 %v300_v47  ;;  %v258_v7 = vld [vmem:[%s1241_s14 + $0x38] sm:$0xff]  ;;  %v548_v36 = vld [vmem:[#allocation7 + $0x40] sm:$0xff]  ;;  %v549_v38 = vld [vmem:[#allocation7 + $0x48] sm:$0xff]  ;;  %s709_s14 = sshll.u32 %s1288_s28, 4  ;;  %s710_s14 = int_to_ptr.vmem [resolvable:$true] %s709_s14 }
  0x4a   : > { %335 = vmatpush.msra.mxu0 %v265_v48  ;;  %393 = vmatpush.msra.mxu2 %v266_v50  ;;  %v439_v37 = vld [vmem:[#allocation7] sm:$0xff]  ;;  %v440_v39 = vld [vmem:[#allocation7 + $0x8] sm:$0xff]  ;;  %v550_v40 = vld [vmem:[#allocation7 + $0x50] sm:$0xff] }
  0x4b   : > { %364 = vmatpush.msra.mxu1 %v297_v49  ;;  %422 = vmatpush.msra.mxu3 %v298_v51  ;;  %v441_v43 = vld [vmem:[#allocation7 + $0x10] sm:$0xff]  ;;  %v551_v46 = vld [vmem:[#allocation7 + $0x58] sm:$0xff] }
  0x4c   : > { %336 = vmatpush.msra.mxu0 %v263_v52  ;;  %394 = vmatpush.msra.mxu2 %v264_v54  ;;  %v442_v48 = vld [vmem:[#allocation7 + $0x18] sm:$0xff]  ;;  %v665_v49 = vld [vmem:[%s1335_s3 + $0x10] sm:$0xff]  ;;  %v1107_v52 = vmov 0  }
  0x4d   : > { %365 = vmatpush.msra.mxu1 %v295_v53  ;;  %423 = vmatpush.msra.mxu3 %v296_v55  ;;  %v666_v53 = vld [vmem:[%s1335_s3 + $0x18] sm:$0xff] }
  0x4e   : > { %337 = vmatpush.msra.mxu0 %v261_v56  ;;  %395 = vmatpush.msra.mxu2 %v262_v58 }
  0x4f   : > { %366 = vmatpush.msra.mxu1 %v293_v57  ;;  %424 = vmatpush.msra.mxu3 %v294_v59  ;;  %v663_v57 = vld [vmem:[%s1335_s3] sm:$0xff] }
  0x50   : > { %338 = vmatpush.msra.mxu0 %v259_v60  ;;  %396 = vmatpush.msra.mxu2 %v260_v62  ;;  %v598_v60 = vld [vmem:[#allocation7 + $0x60] sm:$0xff]  ;;  %v664_v62 = vld [vmem:[%s1335_s3 + $0x8] sm:$0xff] }
  0x51   : > { %367 = vmatpush.msra.mxu1 %v291_v61  ;;  %425 = vmatpush.msra.mxu3 %v292_v63  ;;  %v444_v61 = vld [vmem:[#allocation7 + $0x20] sm:$0xff]  ;;  %v599_v63 = vld [vmem:[#allocation7 + $0x68] sm:$0xff] }
  0x52   : > { %339 = vmatmul.f32.vlgmr.msra.gmra.mxu0 %v251_v0  ;;  %368 = vmatmul.f32.vlgmr.msra.gmra.mxu1 %v252_v1 }
  0x53   : > { %397 = vmatmul.f32.vlgmr.msra.gmra.mxu2 %v251_v0  ;;  %426 = vmatmul.f32.vlgmr.msra.gmra.mxu3 %v252_v1  ;;  %v445_v0 = vld [vmem:[#allocation7 + $0x28] sm:$0xff]  ;;  %v600_v1 = vld [vmem:[#allocation7 + $0x70] sm:$0xff] }
  0x54   : > { %936 = vset.pattern.permute.xlu0 %v1107_v52  ;;  %937 = vset.pattern.permute.xlu1 %v1107_v52 }
  0x55   : > { %935 = vset.pattern.permute.xlu2 %v1107_v52 }
  0x56   : > { %669 = vperm.xlu2 %935, %v663_v57  }
  0x5a   : > { %342 = vmatmul.f32.gmra.mxu0 %v253_v2  ;;  %371 = vmatmul.f32.gmra.mxu1 %v254_v3 }
  0x5b   : > { %400 = vmatmul.f32.gmra.mxu2 %v253_v2  ;;  %429 = vmatmul.f32.gmra.mxu3 %v254_v3  ;;  %v446_v2 = vld [vmem:[#allocation7 + $0x30] sm:$0xff]  ;;  %v601_v3 = vld [vmem:[#allocation7 + $0x78] sm:$0xff] }
  0x5e   : > { %674 = vperm.xlu2 %935, %v664_v62  }
  0x62   : > { %345 = vmatmul.f32.gmra.mxu0 %v255_v4  ;;  %374 = vmatmul.f32.gmra.mxu1 %v256_v5 }
  0x63   : > { %403 = vmatmul.f32.gmra.mxu2 %v255_v4  ;;  %432 = vmatmul.f32.gmra.mxu3 %v256_v5  ;;  %v447_v4 = vld [vmem:[#allocation7 + $0x38] sm:$0xff] }
  0x6a   : > { %348 = vmatmul.f32.gmra.mxu0 %v257_v6  ;;  %377 = vmatmul.f32.gmra.mxu1 %v258_v7 }
  0x6b   : > { %406 = vmatmul.f32.gmra.mxu2 %v257_v6  ;;  %435 = vmatmul.f32.gmra.mxu3 %v258_v7 }
  0xcf   : > { %v340_v8 = vpop.f32.mrf.mxu0  ;;  %v369_v9 = vpop.f32.mrf.mxu1 }
  0xd0   : > { %v370_v21 = vadd.f32 %v369_v9, %v340_v8 }
  0xd6   : > { %v398_v10 = vpop.f32.mrf.mxu2  ;;  %v427_v11 = vpop.f32.mrf.mxu3 }
  0xd7   : > { %v343_v12 = vpop.f32.mrf.mxu0  ;;  %v372_v13 = vpop.f32.mrf.mxu1  ;;  %v428_v22 = vadd.f32 %v427_v11, %v398_v10 }
  0xd8   : > { %v373_v14 = vadd.f32 %v372_v13, %v343_v12  ;;  %v670_v11 = vpop.permute.xlu2 %669 }
  0xd9   : > { %v930_v28 = vpack.i.bf16 %v370_v21, %v428_v22 }
  0xde   : > { %v401_v15 = vpop.f32.mrf.mxu2  ;;  %v430_v16 = vpop.f32.mrf.mxu3 }
  0xdf   : > { %v431_v17 = vadd.f32 %v430_v16, %v401_v15  ;;  %v346_v18 = vpop.f32.mrf.mxu0  ;;  %v375_v19 = vpop.f32.mrf.mxu1 }
  0xe0   : > { %v376_v29 = vadd.f32 %v375_v19, %v346_v18 }
  0xe1   : > { %v925_v20 = vpack.i.bf16 %v373_v14, %v431_v17 }
  0xe3   : > { %926 = vrot.lane.b32.xlu1 %v925_v20, %s1106_s21  ;;  %v675_v20 = vpop.permute.xlu2 %674 }
  0xe6   : > { %v404_v23 = vpop.f32.mrf.mxu2  ;;  %v433_v24 = vpop.f32.mrf.mxu3 }
  0xe7   : > { %v349_v25 = vpop.f32.mrf.mxu0  ;;  %v378_v26 = vpop.f32.mrf.mxu1  ;;  %v434_v33 = vadd.f32 %v433_v24, %v404_v23 }
  0xe8   : > { %v379_v27 = vadd.f32 %v378_v26, %v349_v25 }
  0xe9   : > { %v920_v35 = vpack.i.bf16 %v376_v29, %v434_v33 }
  0xea   : > { %530 = vmatpush.msrb.mxu1 %v379_v27 }
  0xeb   : > { %931 = vrot.lane.b32.xlu1 %v930_v28, %s1106_s21 }
  0xec   : > { %531 = vmatpush.msrb.mxu1 %v376_v29 }
  0xee   : > { %v407_v30 = vpop.f32.mrf.mxu2  ;;  %v436_v31 = vpop.f32.mrf.mxu3  ;;  %532 = vmatpush.msrb.mxu1 %v373_v14 }
  0xef   : > { %v437_v32 = vadd.f32 %v436_v31, %v407_v30 }
  0xf0   : > { %533 = vmatpush.msrb.mxu1 %v370_v21 }
  0xf1   : > { %576 = vmatpush.msrb.mxu2 %v437_v32  ;;  %v915_v34 = vpack.i.bf16 %v379_v27, %v437_v32  ;;  %821 = vmatmul.msk.f32.vlgmr.msrb.gmra.mxu1 %vm464_vm0, %v439_v37 }
  0xf3   : > { %577 = vmatpush.msrb.mxu2 %v434_v33  ;;  %916 = vrot.lane.b32.xlu0 %v915_v34, %s1106_s21 }
  0xf4   : > { %684 = vperm.xlu1 %937, %v666_v53  }
  0xf5   : > { %578 = vmatpush.msrb.mxu2 %v431_v17 }
  0xf7   : > { %579 = vmatpush.msrb.mxu2 %v428_v22 }
  0xf8   : > { %825 = vmatmul.msk.f32.vlgmr.msrb.gmra.mxu2 %vm464_vm0, %v548_v36 }
  0xf9   : > { %822 = vmatmul.msk.f32.gmra.mxu1 %vm464_vm0, %v440_v39 }
  0xfb   : > { %921 = vrot.lane.b32.xlu0 %v920_v35, %s1106_s21  ;;  %s711_s21 = sshll.u32 %s708_s13, 4  ;;  %s712_s21 = int_to_ptr.hbm [resolvable:$true] %s711_s21 }
  0xfc   : > { %s1042_s26 = sshra.s32 %s712_s21, 4  ;;  %s1043_s26 = int_to_ptr.hbm [resolvable:$true] %s1042_s26 }
  0xfd   : > { %s1044_s6 = scalar_lea.hbm %s1043_s26, 32  ;;  %p1049_p11 = scmp.lt.s32.totalorder %s1043_s26, %s1336_s4 }
  0xfe   : > { %p1045_p1 = scmp.ne.s32.totalorder %s1043_s26, %s1044_s6  ;;  %p1050_p9 = scmp.lt.s32.totalorder %s1048_s9, %s1044_s6 }
 0x100   : > { %826 = vmatmul.msk.f32.gmra.mxu2 %vm464_vm0, %v549_v38  ;;  %p1046_p4 = pnand %p1045_p1, %p1207_p5  ;;  %p1051_p2 = por %p1050_p9, %p1049_p11 }
 0x101   : > { %823 = vmatmul.msk.f32.gmra.mxu1 %vm464_vm0, %v441_v43 }
 0x102   : > { %p1047_p8 = pneg %p1046_p4 }
 0x103   : > { %679 = vperm.xlu0 %936, %v665_v49  }
 0x104   : > { %p1052_p10 = pnand %p1051_p2, %p1047_p8 }
 0x108   : > { %827 = vmatmul.msk.f32.gmra.mxu2 %vm464_vm0, %v550_v40 }
 0x109   : > { %824 = vmatmul.msk.f32.gmra.mxu1 %vm464_vm0, %v442_v48 }
 0x110   : > { %828 = vmatmul.msk.f32.gmra.mxu2 %vm464_vm0, %v551_v46 }
 0x155   : > { %v927_v41 = vpop.permute.xlu1 %926 }
 0x156   : > { %v929_v55 = vunpack.i.h.bf16 %v927_v41  ;;  %v928_v56 = vunpack.i.l.bf16 %v927_v41 }
 0x15d   : > { %v932_v54 = vpop.permute.xlu1 %931 }
 0x15e   : > { %v934_v58 = vunpack.i.h.bf16 %v932_v54  ;;  %v933_v59 = vunpack.i.l.bf16 %v932_v54 }
 0x165   : > { %v917_v42 = vpop.permute.xlu0 %916 }
 0x166   : > { %v919_v44 = vunpack.i.h.bf16 %v917_v42  ;;  %v918_v45 = vunpack.i.l.bf16 %v917_v42  ;;  %v685_v38 = vpop.permute.xlu1 %684 }
 0x168   : > { %489 = vmatpush.msrb.mxu0 %v919_v44  ;;  %642 = vmatpush.msrb.mxu3 %v918_v45 }
 0x16d   : > { %v922_v47 = vpop.permute.xlu0 %921 }
 0x16e   : > { %v924_v50 = vunpack.i.h.bf16 %v922_v47  ;;  %v923_v51 = vunpack.i.l.bf16 %v922_v47  ;;  %v535_v5 = vpop.f32.mrf.mxu1 }
 0x170   : > { %490 = vmatpush.msrb.mxu0 %v924_v50  ;;  %643 = vmatpush.msrb.mxu3 %v923_v51 }
 0x172   : > { %491 = vmatpush.msrb.mxu0 %v929_v55  ;;  %644 = vmatpush.msrb.mxu3 %v928_v56 }
 0x174   : > { %492 = vmatpush.msrb.mxu0 %v934_v58  ;;  %645 = vmatpush.msrb.mxu3 %v933_v59 }
 0x175   : > { %829 = vmatmul.msk.f32.vlgmr.msrb.gmra.mxu3 %vm464_vm0, %v598_v60  ;;  %817 = vmatmul.msk.f32.vlgmr.msrb.gmra.mxu0 %vm464_vm0, %v444_v61  ;;  %v680_v28 = vpop.permute.xlu0 %679 }
 0x176   : > { %v538_v9 = vpop.f32.mrf.mxu1 }
 0x17b   : > { %v581_v6 = vpop.f32.mrf.mxu2 }
 0x17d   : > { %830 = vmatmul.msk.f32.gmra.mxu3 %vm464_vm0, %v599_v63  ;;  %818 = vmatmul.msk.f32.gmra.mxu0 %vm464_vm0, %v445_v0 }
 0x17e   : > { %v541_v19 = vpop.f32.mrf.mxu1 }
 0x183   : > { %v584_v12 = vpop.f32.mrf.mxu2 }
 0x185   : > { %831 = vmatmul.msk.f32.gmra.mxu3 %vm464_vm0, %v600_v1  ;;  %819 = vmatmul.msk.f32.gmra.mxu0 %vm464_vm0, %v446_v2 }
 0x186   : > { %v544_v30 = vpop.f32.mrf.mxu1 }
 0x18b   : > { %v587_v22 = vpop.f32.mrf.mxu2 }
 0x18d   : > { %832 = vmatmul.msk.f32.gmra.mxu3 %vm464_vm0, %v601_v3  ;;  %820 = vmatmul.msk.f32.gmra.mxu0 %vm464_vm0, %v447_v4 }
 0x193   : > { %v590_v33 = vpop.f32.mrf.mxu2 }
 0x1f2   : > { %v494_v7 = vpop.f32.mrf.mxu0 }
 0x1f3   : > { %v536_v8 = vadd.f32 %v535_v5, %v494_v7 }
 0x1f5   : > { %v593_v10 = vadd.f32 %v581_v6, %v536_v8 }
 0x1f8   : > { %v647_v13 = vpop.f32.mrf.mxu3 }
 0x1f9   : > { %v659_v14 = vadd.f32 %v647_v13, %v593_v10 }
 0x1fa   : > { %v497_v15 = vpop.f32.mrf.mxu0 }
 0x1fb   : > { %v687_v16 = vadd.f32 %v670_v11, %v659_v14  ;;  %v539_v17 = vadd.f32 %v538_v9, %v497_v15 }
 0x1fd   : > { %692 = vst.msk [vmem:[%s1288_s28] sm:$0xff] %vm691_vm1, %v687_v16  ;;  %v594_v18 = vadd.f32 %v584_v12, %v539_v17 }
 0x200   : > { %v650_v21 = vpop.f32.mrf.mxu3 }
 0x201   : > { %v660_v23 = vadd.f32 %v650_v21, %v594_v18 }
 0x202   : > { %v500_v24 = vpop.f32.mrf.mxu0 }
 0x203   : > { %v688_v25 = vadd.f32 %v675_v20, %v660_v23  ;;  %v542_v26 = vadd.f32 %v541_v19, %v500_v24 }
 0x205   : > { %693 = vst.msk [vmem:[%s1288_s28 + $0x8] sm:$0xff] %vm691_vm1, %v688_v25  ;;  %v595_v27 = vadd.f32 %v587_v22, %v542_v26 }
 0x208   : > { %v653_v29 = vpop.f32.mrf.mxu3 }
 0x209   : > { %v661_v31 = vadd.f32 %v653_v29, %v595_v27 }
 0x20a   : > { %v503_v32 = vpop.f32.mrf.mxu0 }
 0x20b   : > { %v689_v34 = vadd.f32 %v680_v28, %v661_v31  ;;  %v545_v35 = vadd.f32 %v544_v30, %v503_v32 }
 0x20d   : > { %694 = vst.msk [vmem:[%s1288_s28 + $0x10] sm:$0xff] %vm691_vm1, %v689_v34  ;;  %v596_v36 = vadd.f32 %v590_v33, %v545_v35 }
 0x210   : > { %v656_v37 = vpop.f32.mrf.mxu3 }
 0x211   : > { %v662_v39 = vadd.f32 %v656_v37, %v596_v36 }
 0x213   : > { %v690_v40 = vadd.f32 %v685_v38, %v662_v39 }
 0x215   : > { %695 = vst.msk [vmem:[%s1288_s28 + $0x18] sm:$0xff] %vm691_vm1, %v690_v40 }
 0x216   : > { %1055 = shalt.err (!%p1052_p10)
}
 0x217   : > { %s1108_s24 = smov 128   ;;  %s1109_s27 = smov 8  }
 0x218   : > { %850 = dma.vmem_to_hbm [thread:$0]  (%p1207_p5), %s710_s14, 512, %s712_s21, %s697_s19, %s1108_s24, %s1108_s24, %s1109_s27  }
 0x219 PF: > { %s726_s25 = sand.u32 1, %s1086_s15   ;;  %p1342_p12 = scmp.ge.s32.totalorder %s1098_s18, 2 }
 0x21a   : > { %s727_s28 = scalar_lea.sflag [#allocation4], %s726_s25 }
 0x21b   : > { %p864_p13 = pnand %p1342_p12, %p1170_p6 }
 0x21d   : > { %p865_p0 = pneg %p864_p13 }
 0x21f   : > { %1081 = dma.done.wait (%p865_p0), %s727_s28, 512  }
 0x220   : > { %1083 = vsyncadd (%p865_p0), %s727_s28, 4294966784  ;;  %p18_p3 = scmp.ge.s32.totalorder %s1194_s12, 4   ;;  %s1343_s15 = smov %s1090_s16 }
 0x221   : > { %s1344_s16 = smov %s1094_s17  ;;  %s1345_s17 = smov %s1203_s20 }
 0x222   : > { %s1346_s18 = smov %s1194_s12  ;;  %20 = sbr.rel (!%p18_p3) target bundleno = 6 (0x6), region = 92 }
 0x227   :  { %733 = vsyncpa [#allocation3], 1 }
 0x228   :  { %735 = vsyncpa [#allocation3 + $0x1], 1 }
 0x229   :  { %736 = vsyncpa [#allocation6], 1 }
 0x22a   :  { %737 = vsyncpa [#allocation4], 1 }
 0x22b   :  { %739 = vsyncpa [#allocation4 + $0x1], 1 }

</bundles_post_ra>
